<compile_context>
chip_gen: v7x
topology: tpu7x:2x2x1
jax: 0.10.0
libtpu: 0.0.40
codegen_flags: <defaults>
</compile_context>

<pallas_src>
import functools

import jax
import jax.numpy as jnp
from jax import lax
from jax.experimental import pallas as pl
from jax.experimental.pallas import tpu as pltpu

B = 2          # batch
S = 8          # sequence length (module uses 512; small shape for the demo)
D_IN = 32      # token-embedding width
D_MODEL = 128  # "encoder" hidden width (t5-small is 512)
VOCAB = 100


def score_kernel(lens_ref, e_ref, w_ref, out_ref, *, n_batch, seq):
    """Whole problem in one invocation.

    lens_ref : SMEM (2, B) int32    [0,b]=len(article1_b), [1,b]=len(article2_b)
    e_ref    : VMEM (2*B*S, D_IN)   bf16, rows [0,B*S) = article1, rest article2
    w_ref    : VMEM (D_IN, D_MODEL) bf16 synthetic encoder projection
    out_ref  : VMEM (8, 128) f32    score for batch b written at [0, b]
    """
    # One fused MXU matmul for both articles and all batch elements.
    h = jnp.dot(e_ref[...], w_ref[...], preferred_element_type=jnp.float32)

    # CosineSimilarity prep: L2-normalize rows.  rsqrt runs on the EUP slot.
    eps2 = jnp.float32(1e-16)
    hn = h * lax.rsqrt(jnp.sum(h * h, axis=-1, keepdims=True) + eps2)

    i_idx = lax.broadcasted_iota(jnp.int32, (seq, seq), 0)
    j_idx = lax.broadcasted_iota(jnp.int32, (seq, seq), 1)
    row_idx = lax.broadcasted_iota(jnp.int32, (seq, 1), 0)
    col_idx = lax.broadcasted_iota(jnp.int32, (1, seq), 1)

    neg = jnp.float32(-1e30)   # keep the masking path in f32
    scores = []
    for b in range(n_batch):   # tiny static unroll
        h1n = hn[b * seq:(b + 1) * seq, :]                          # (S, D)
        h2n = hn[(n_batch + b) * seq:(n_batch + b + 1) * seq, :]    # (S, D)

        # sim[i, j] = cos(article1 tok i, article2 tok j)  (2-D MXU dot)
        sim = lax.dot_general(h1n, h2n, (((1,), (1,)), ((), ())),
                              preferred_element_type=jnp.float32)

        len1 = lens_ref[0, b]
        len2 = lens_ref[1, b]
        valid = (i_idx < len1) & (j_idx < len2)
        simm = jnp.where(valid, sim, neg)

        row_max = jnp.max(simm, axis=1, keepdims=True)              # (S, 1)
        row_max = jnp.where(row_idx < len1, row_max, jnp.float32(0.0))
        col_max = jnp.max(simm, axis=0, keepdims=True)              # (1, S)
        col_max = jnp.where(col_idx < len2, col_max, jnp.float32(0.0))

        n1 = len1.astype(jnp.float32)
        n2 = len2.astype(jnp.float32)
        # NOTE: n1+n2 == 0 gives nan, same as the PyTorch original (no guard).
        scores.append((jnp.sum(row_max) + jnp.sum(col_max)) / (n1 + n2))

    # Single lane-dense output tile: score_b lands at [0, b].
    sub = lax.broadcasted_iota(jnp.int32, out_ref.shape, 0)
    lane = lax.broadcasted_iota(jnp.int32, out_ref.shape, 1)
    out = jnp.zeros(out_ref.shape, jnp.float32)
    for b in range(n_batch):
        out = jnp.where((sub == 0) & (lane == b), scores[b], out)
    out_ref[...] = out


def forward_similarity(emb1, emb2, w, mask1, mask2):
    """emb1/emb2: (B, S, D_IN) f32; mask1/mask2: (B, S) {0,1}.  -> (B,) score."""
    b, s, d_in = emb1.shape

    # Scalar lengths -> SMEM (replaces lane-sparse mask tensors).
    lens = jnp.stack([jnp.sum(mask1, axis=1), jnp.sum(mask2, axis=1)],
                     axis=0).astype(jnp.int32)                      # (2, B)

    # One fused LHS for the projection; bf16 MXU operands (f32 accumulate).
    e_all = jnp.concatenate([emb1.reshape(b * s, d_in),
                             emb2.reshape(b * s, d_in)],
                            axis=0).astype(jnp.bfloat16)            # (2*B*S, D_IN)
    w_bf = w.astype(jnp.bfloat16)

    out = pl.pallas_call(
        functools.partial(score_kernel, n_batch=b, seq=s),
        out_shape=jax.ShapeDtypeStruct((8, 128), jnp.float32),
        in_specs=[
            pl.BlockSpec(memory_space=pltpu.MemorySpace.SMEM),   # lens
            pl.BlockSpec(memory_space=pltpu.MemorySpace.VMEM),   # e_all
            pl.BlockSpec(memory_space=pltpu.MemorySpace.VMEM),   # w
        ],
        out_specs=pl.BlockSpec(memory_space=pltpu.MemorySpace.VMEM),
    )(lens, e_all, w_bf)
    return out[0, :b]


def ref_forward_similarity(emb1, emb2, w, mask1, mask2):
    """Pure-JAX reference matching PyTorch get_scores semantics (f32)."""
    hp = jax.lax.Precision.HIGHEST
    h1 = jnp.einsum('bsd,de->bse', emb1, w, precision=hp)
    h2 = jnp.einsum('bsd,de->bse', emb2, w, precision=hp)
    h1n = h1 / jnp.maximum(jnp.linalg.norm(h1, axis=-1, keepdims=True), 1e-8)
    h2n = h2 / jnp.maximum(jnp.linalg.norm(h2, axis=-1, keepdims=True), 1e-8)
    sim = jnp.einsum('bie,bje->bij', h1n, h2n, precision=hp)
    m1 = mask1.astype(jnp.float32)
    m2 = mask2.astype(jnp.float32)
    valid = m1[:, :, None] * m2[:, None, :]
    simm = jnp.where(valid > 0, sim, -1e30)
    row_max = jnp.where(m1 > 0, jnp.max(simm, axis=2), 0.0)
    col_max = jnp.where(m2 > 0, jnp.max(simm, axis=1), 0.0)
    n1 = jnp.sum(m1, axis=1)
    n2 = jnp.sum(m2, axis=1)
    return (jnp.sum(row_max, axis=1) + jnp.sum(col_max, axis=1)) / (n1 + n2)


if __name__ == "__main__":
    key = jax.random.PRNGKey(0)
    k_emb, k_w, k_id1, k_id2 = jax.random.split(key, 4)

    # Deterministic synthetic parameters (stand-in for pretrained T5 weights).
    embed_table = jax.random.normal(k_emb, (VOCAB, D_IN), jnp.float32) * 0.1
    w_proj = jax.random.normal(k_w, (D_IN, D_MODEL), jnp.float32) * 0.1

    # Inputs: token ids + contiguous-prefix attention masks (the PyTorch code
    # assumes this when it uses sum(mask) as a length).
    article_1_ids = jax.random.randint(k_id1, (B, S), 0, VOCAB)
    article_2_ids = jax.random.randint(k_id2, (B, S), 0, VOCAB)
    lens_1 = jnp.array([8, 5], jnp.int32)
    lens_2 = jnp.array([6, 8], jnp.int32)
    pos = jnp.arange(S)[None, :]
    article_1_att_mask = (pos < lens_1[:, None]).astype(jnp.int32)
    article_2_att_mask = (pos < lens_2[:, None]).astype(jnp.int32)

    # Embedding lookup (glue).
    article_1_emb = embed_table[article_1_ids] * article_1_att_mask[..., None]
    article_2_emb = embed_table[article_2_ids] * article_2_att_mask[..., None]

    score = forward_similarity(article_1_emb, article_2_emb, w_proj,
                               article_1_att_mask, article_2_att_mask)
    score = jax.block_until_ready(score)

    # Reference on bf16-rounded operands (the kernel feeds the MXU in bf16;
    # everything downstream is f32 in both).
    q = lambda x: x.astype(jnp.bfloat16).astype(jnp.float32)
    ref = ref_forward_similarity(q(article_1_emb), q(article_2_emb), q(w_proj),
                                 article_1_att_mask, article_2_att_mask)

    assert score.shape == (B,)
    assert jnp.allclose(score, ref, atol=5e-3, rtol=5e-3), (score, ref)

    print("KERNEL_OK")
</pallas_src>

<mosaic_0001>
module attributes {stable_mosaic.version = 11 : i64} {
  func.func @score_kernel(%arg0: memref<2x2xi32, #tpu.memory_space<smem>>, %arg1: memref<32x32xbf16, #tpu.memory_space<vmem>>, %arg2: memref<32x128xbf16, #tpu.memory_space<vmem>>, %arg3: memref<8x128xf32, #tpu.memory_space<vmem>>) attributes {dimension_semantics = [], scalar_prefetch = 0 : i64, scratch_operands = 0 : i64, tpu.core_type = #tpu.core_type<tc>} {
    %c0 = arith.constant 0 : index
    %c0_0 = arith.constant 0 : index
    %0 = vector.load %arg1[%c0, %c0_0] : memref<32x32xbf16, #tpu.memory_space<vmem>>, vector<32x32xbf16>
    %c0_1 = arith.constant 0 : index
    %c0_2 = arith.constant 0 : index
    %1 = vector.load %arg2[%c0_1, %c0_2] : memref<32x128xbf16, #tpu.memory_space<vmem>>, vector<32x128xbf16>
    %cst = arith.constant dense<0.000000e+00> : vector<32x128xf32>
    %2 = tpu.matmul %0, %1, %cst {dimension_numbers = #tpu.dot_dimension_numbers<[1], [0], [0], [1], [0, 0, 1, 1], [], []>} : vector<32x32xbf16>, vector<32x128xbf16>, vector<32x128xf32> -> vector<32x128xf32>
    %3 = arith.mulf %2, %2 : vector<32x128xf32>
    %cst_3 = arith.constant dense<0.000000e+00> : vector<32xf32>
    %4 = vector.multi_reduction <add>, %3, %cst_3 [1] : vector<32x128xf32> to vector<32xf32>
    %5 = vector.shape_cast %4 : vector<32xf32> to vector<32x1xf32>
    %cst_4 = arith.constant 1.000000e-16 : f32
    %6 = vector.broadcast %cst_4 : f32 to vector<32x1xf32>
    %7 = arith.addf %5, %6 : vector<32x1xf32>
    %8 = math.rsqrt %7 : vector<32x1xf32>
    %9 = vector.broadcast %8 : vector<32x1xf32> to vector<32x128xf32>
    %10 = arith.mulf %2, %9 : vector<32x128xf32>
    %11 = tpu.iota {dimensions = array<i32: 0>} : vector<8x8xi32>
    %12 = tpu.iota {dimensions = array<i32: 1>} : vector<8x8xi32>
    %13 = tpu.iota {dimensions = array<i32: 0>} : vector<8x1xi32>
    %14 = tpu.iota {dimensions = array<i32: 1>} : vector<1x8xi32>
    %15 = vector.extract_strided_slice %10 {offsets = [0, 0], sizes = [8, 128], strides = [1, 1]} : vector<32x128xf32> to vector<8x128xf32>
    %16 = vector.extract_strided_slice %10 {offsets = [16, 0], sizes = [8, 128], strides = [1, 1]} : vector<32x128xf32> to vector<8x128xf32>
    %cst_5 = arith.constant dense<0.000000e+00> : vector<8x8xf32>
    %17 = tpu.matmul %15, %16, %cst_5 {dimension_numbers = #tpu.dot_dimension_numbers<[1], [1], [0], [0], [0, 0, 1, 0], [], []>} : vector<8x128xf32>, vector<8x128xf32>, vector<8x8xf32> -> vector<8x8xf32>
    %c0_6 = arith.constant 0 : index
    %c0_7 = arith.constant 0 : index
    %18 = memref.load %arg0[%c0_6, %c0_7] : memref<2x2xi32, #tpu.memory_space<smem>>
    %c1 = arith.constant 1 : index
    %c0_8 = arith.constant 0 : index
    %19 = memref.load %arg0[%c1, %c0_8] : memref<2x2xi32, #tpu.memory_space<smem>>
    %20 = vector.broadcast %18 : i32 to vector<8x8xi32>
    %21 = arith.cmpi slt, %11, %20 : vector<8x8xi32>
    %22 = vector.broadcast %19 : i32 to vector<8x8xi32>
    %23 = arith.cmpi slt, %12, %22 : vector<8x8xi32>
    %24 = arith.andi %21, %23 : vector<8x8xi1>
    %cst_9 = arith.constant -1.000000e+30 : f32
    %25 = vector.broadcast %cst_9 : f32 to vector<8x8xf32>
    %26 = arith.select %24, %17, %25 : vector<8x8xi1>, vector<8x8xf32>
    %cst_10 = arith.constant dense<0xFF800000> : vector<8xf32>
    %27 = vector.multi_reduction <maximumf>, %26, %cst_10 [1] : vector<8x8xf32> to vector<8xf32>
    %28 = vector.shape_cast %27 : vector<8xf32> to vector<8x1xf32>
    %29 = vector.broadcast %18 : i32 to vector<8x1xi32>
    %30 = arith.cmpi slt, %13, %29 : vector<8x1xi32>
    %cst_11 = arith.constant 0.000000e+00 : f32
    %31 = vector.broadcast %cst_11 : f32 to vector<8x1xf32>
    %32 = arith.select %30, %28, %31 : vector<8x1xi1>, vector<8x1xf32>
    %cst_12 = arith.constant dense<0xFF800000> : vector<8xf32>
    %33 = vector.multi_reduction <maximumf>, %26, %cst_12 [0] : vector<8x8xf32> to vector<8xf32>
    %34 = vector.shape_cast %33 : vector<8xf32> to vector<1x8xf32>
    %35 = vector.broadcast %19 : i32 to vector<1x8xi32>
    %36 = arith.cmpi slt, %14, %35 : vector<1x8xi32>
    %cst_13 = arith.constant 0.000000e+00 : f32
    %37 = vector.broadcast %cst_13 : f32 to vector<1x8xf32>
    %38 = arith.select %36, %34, %37 : vector<1x8xi1>, vector<1x8xf32>
    %39 = arith.sitofp %18 : i32 to f32
    %40 = arith.sitofp %19 : i32 to f32
    %41 = vector.shape_cast %32 : vector<8x1xf32> to vector<1x8x1xf32>
    %cst_14 = arith.constant dense<0.000000e+00> : vector<1xf32>
    %42 = vector.multi_reduction <add>, %41, %cst_14 [1, 2] : vector<1x8x1xf32> to vector<1xf32>
    %43 = vector.shape_cast %42 : vector<1xf32> to vector<1x1x1xf32>
    %44 = vector.extract %43[0, 0, 0] : f32 from vector<1x1x1xf32>
    %45 = vector.shape_cast %38 : vector<1x8xf32> to vector<1x1x8xf32>
    %cst_15 = arith.constant dense<0.000000e+00> : vector<1xf32>
    %46 = vector.multi_reduction <add>, %45, %cst_15 [1, 2] : vector<1x1x8xf32> to vector<1xf32>
    %47 = vector.shape_cast %46 : vector<1xf32> to vector<1x1x1xf32>
    %48 = vector.extract %47[0, 0, 0] : f32 from vector<1x1x1xf32>
    %49 = arith.addf %44, %48 : f32
    %50 = arith.addf %39, %40 : f32
    %51 = arith.divf %49, %50 : f32
    %52 = vector.extract_strided_slice %10 {offsets = [8, 0], sizes = [8, 128], strides = [1, 1]} : vector<32x128xf32> to vector<8x128xf32>
    %53 = vector.extract_strided_slice %10 {offsets = [24, 0], sizes = [8, 128], strides = [1, 1]} : vector<32x128xf32> to vector<8x128xf32>
    %cst_16 = arith.constant dense<0.000000e+00> : vector<8x8xf32>
    %54 = tpu.matmul %52, %53, %cst_16 {dimension_numbers = #tpu.dot_dimension_numbers<[1], [1], [0], [0], [0, 0, 1, 0], [], []>} : vector<8x128xf32>, vector<8x128xf32>, vector<8x8xf32> -> vector<8x8xf32>
    %c0_17 = arith.constant 0 : index
    %c1_18 = arith.constant 1 : index
    %55 = memref.load %arg0[%c0_17, %c1_18] : memref<2x2xi32, #tpu.memory_space<smem>>
    %c1_19 = arith.constant 1 : index
    %c1_20 = arith.constant 1 : index
    %56 = memref.load %arg0[%c1_19, %c1_20] : memref<2x2xi32, #tpu.memory_space<smem>>
    %57 = vector.broadcast %55 : i32 to vector<8x8xi32>
    %58 = arith.cmpi slt, %11, %57 : vector<8x8xi32>
    %59 = vector.broadcast %56 : i32 to vector<8x8xi32>
    %60 = arith.cmpi slt, %12, %59 : vector<8x8xi32>
    %61 = arith.andi %58, %60 : vector<8x8xi1>
    %cst_21 = arith.constant -1.000000e+30 : f32
    %62 = vector.broadcast %cst_21 : f32 to vector<8x8xf32>
    %63 = arith.select %61, %54, %62 : vector<8x8xi1>, vector<8x8xf32>
    %cst_22 = arith.constant dense<0xFF800000> : vector<8xf32>
    %64 = vector.multi_reduction <maximumf>, %63, %cst_22 [1] : vector<8x8xf32> to vector<8xf32>
    %65 = vector.shape_cast %64 : vector<8xf32> to vector<8x1xf32>
    %66 = vector.broadcast %55 : i32 to vector<8x1xi32>
    %67 = arith.cmpi slt, %13, %66 : vector<8x1xi32>
    %cst_23 = arith.constant 0.000000e+00 : f32
    %68 = vector.broadcast %cst_23 : f32 to vector<8x1xf32>
    %69 = arith.select %67, %65, %68 : vector<8x1xi1>, vector<8x1xf32>
    %cst_24 = arith.constant dense<0xFF800000> : vector<8xf32>
    %70 = vector.multi_reduction <maximumf>, %63, %cst_24 [0] : vector<8x8xf32> to vector<8xf32>
    %71 = vector.shape_cast %70 : vector<8xf32> to vector<1x8xf32>
    %72 = vector.broadcast %56 : i32 to vector<1x8xi32>
    %73 = arith.cmpi slt, %14, %72 : vector<1x8xi32>
    %cst_25 = arith.constant 0.000000e+00 : f32
    %74 = vector.broadcast %cst_25 : f32 to vector<1x8xf32>
    %75 = arith.select %73, %71, %74 : vector<1x8xi1>, vector<1x8xf32>
    %76 = arith.sitofp %55 : i32 to f32
    %77 = arith.sitofp %56 : i32 to f32
    %78 = vector.shape_cast %69 : vector<8x1xf32> to vector<1x8x1xf32>
    %cst_26 = arith.constant dense<0.000000e+00> : vector<1xf32>
    %79 = vector.multi_reduction <add>, %78, %cst_26 [1, 2] : vector<1x8x1xf32> to vector<1xf32>
    %80 = vector.shape_cast %79 : vector<1xf32> to vector<1x1x1xf32>
    %81 = vector.extract %80[0, 0, 0] : f32 from vector<1x1x1xf32>
    %82 = vector.shape_cast %75 : vector<1x8xf32> to vector<1x1x8xf32>
    %cst_27 = arith.constant dense<0.000000e+00> : vector<1xf32>
    %83 = vector.multi_reduction <add>, %82, %cst_27 [1, 2] : vector<1x1x8xf32> to vector<1xf32>
    %84 = vector.shape_cast %83 : vector<1xf32> to vector<1x1x1xf32>
    %85 = vector.extract %84[0, 0, 0] : f32 from vector<1x1x1xf32>
    %86 = arith.addf %81, %85 : f32
    %87 = arith.addf %76, %77 : f32
    %88 = arith.divf %86, %87 : f32
    %89 = tpu.iota {dimensions = array<i32: 0>} : vector<8x128xi32>
    %90 = tpu.iota {dimensions = array<i32: 1>} : vector<8x128xi32>
    %cst_28 = arith.constant 0.000000e+00 : f32
    %91 = vector.broadcast %cst_28 : f32 to vector<8x128xf32>
    %c0_i32 = arith.constant 0 : i32
    %92 = vector.broadcast %c0_i32 : i32 to vector<8x128xi32>
    %93 = arith.cmpi eq, %89, %92 : vector<8x128xi32>
    %c0_i32_29 = arith.constant 0 : i32
    %94 = vector.broadcast %c0_i32_29 : i32 to vector<8x128xi32>
    %95 = arith.cmpi eq, %90, %94 : vector<8x128xi32>
    %96 = arith.andi %93, %95 : vector<8x128xi1>
    %97 = vector.broadcast %51 : f32 to vector<8x128xf32>
    %98 = arith.select %96, %97, %91 : vector<8x128xi1>, vector<8x128xf32>
    %c0_i32_30 = arith.constant 0 : i32
    %99 = vector.broadcast %c0_i32_30 : i32 to vector<8x128xi32>
    %100 = arith.cmpi eq, %89, %99 : vector<8x128xi32>
    %c1_i32 = arith.constant 1 : i32
    %101 = vector.broadcast %c1_i32 : i32 to vector<8x128xi32>
    %102 = arith.cmpi eq, %90, %101 : vector<8x128xi32>
    %103 = arith.andi %100, %102 : vector<8x128xi1>
    %104 = vector.broadcast %88 : f32 to vector<8x128xf32>
    %105 = arith.select %103, %104, %98 : vector<8x128xi1>, vector<8x128xf32>
    %c0_31 = arith.constant 0 : index
    %c0_32 = arith.constant 0 : index
    %106 = vector.load %arg3[%c0_31, %c0_32] : memref<8x128xf32, #tpu.memory_space<vmem>>, vector<8x128xf32>
    tpu.vector_store %arg3[%c0_31, %c0_32], %105 {strides = array<i32>} : memref<8x128xf32, #tpu.memory_space<vmem>>, vector<8x128xf32>,
    return
  }
}

</mosaic_0001>

<bundles_post_ra>
// kernel: tpu_custom_call.1
= control target key start
LH: loop header
LB: loop body
LE: loop exit
PB: predicated region body
PF: predicated region fallthrough
CT: control target
= control target key end

     0   :  { %8 = vsyncpa [#allocation5], 0  ;;  %s725_s0 = inlined_call_operand.hbm [shape: s32[2,2], index: 0, kind: input, shape index: {}]   ;;  %s726_s1 = inlined_call_operand.hbm [shape: bf16[32,32], index: 1, kind: input, shape index: {}]   ;;  %s727_s2 = inlined_call_operand.hbm [shape: bf16[32,128], index: 2, kind: input, shape index: {}]   ;;  %s728_s3 = inlined_call_operand.hbm [shape: f32[8,128], index: 3, kind: output, shape index: {}]  }
   0x1   :  { %9 = vsyncpa [#allocation3], 0 }
   0x2   :  { %10 = vsyncpa [#allocation8], 0 }
   0x3   :  { %11 = vsyncpa [#allocation4], 0  ;;  %s504_s14 = scalar_lea.hbm %s725_s0, 32 }
   0x4   :  { %p505_p0 = scmp.ne.s32.totalorder %s725_s0, %s504_s14  ;;  %p508_p1 = scmp.lt.u32.totalorder %s504_s14, %s725_s0 }
   0x6   :  { %p510_p2 = pnand %p508_p1, %p505_p0 }
   0x8   :  { %513 = shalt.err (!%p510_p2)
}
   0x9   :  { %s588_s19 = smov [#allocation2]   ;;  %s589_s22 = smov [#allocation6]  }
   0xa   :  { %19 = dma.hbm_to_smem %s725_s0, 32, %s588_s19, [#allocation5]  }
   0xb   :  { %s25_s23 = sshll.u32 %s589_s22, 4  ;;  %s514_s26 = scalar_lea.hbm %s726_s1, 256  ;;  %s26_s23 = int_to_ptr.vmem [resolvable:$true] %s25_s23 }
   0xc   :  { %p515_p3 = scmp.ne.s32.totalorder %s726_s1, %s514_s26  ;;  %p518_p4 = scmp.lt.u32.totalorder %s514_s26, %s726_s1 }
   0xe   :  { %p520_p5 = pnand %p518_p4, %p515_p3 }
  0x10   :  { %523 = shalt.err (!%p520_p5)
}
  0x11   :  { %s524_s4 = scalar_lea.vmem %s26_s23, 256  ;;  %p529_p7 = scmp.lt.s32.totalorder %s26_s23, %s26_s23 }
  0x12   :  { %p525_p6 = scmp.ne.s32.totalorder %s26_s23, %s524_s4  ;;  %p530_p8 = scmp.lt.s32.totalorder %s524_s4, %s524_s4 }
  0x14   :  { %p531_p9 = por %p530_p8, %p529_p7 }
  0x16   :  { %p532_p10 = pnand %p531_p9, %p525_p6 }
  0x18   :  { %535 = shalt.err (!%p532_p10)
}
  0x19   :  { %s590_s0 = smov 64   ;;  %s591_s5 = smov 4  }
  0x1a   :  { %31 = dma.hbm_to_vmem [thread:$0]  %s726_s1, 256, %s26_s23, [#allocation3], %s590_s0, %s590_s0, %s591_s5  }
  0x1b   :  { %s592_s8 = smov [#allocation7]   ;;  %s536_s12 = scalar_lea.hbm %s727_s2, 256 }
  0x1c   :  { %s37_s9 = sshll.u32 %s592_s8, 4  ;;  %p537_p11 = scmp.ne.s32.totalorder %s727_s2, %s536_s12  ;;  %s38_s9 = int_to_ptr.vmem [resolvable:$true] %s37_s9 }
  0x1d   :  { %p540_p12 = scmp.lt.u32.totalorder %s536_s12, %s727_s2 }
  0x1f   :  { %p542_p13 = pnand %p540_p12, %p537_p11 }
  0x21   :  { %545 = shalt.err (!%p542_p13)
}
  0x22   :  { %s546_s17 = scalar_lea.vmem %s38_s9, 256  ;;  %p551_p1 = scmp.lt.s32.totalorder %s38_s9, %s38_s9 }
  0x23   :  { %p547_p0 = scmp.ne.s32.totalorder %s38_s9, %s546_s17  ;;  %p552_p2 = scmp.lt.s32.totalorder %s546_s17, %s546_s17 }
  0x25   :  { %p553_p3 = por %p552_p2, %p551_p1 }
  0x27   :  { %p554_p4 = pnand %p553_p3, %p547_p0 }
  0x29   :  { %557 = shalt.err (!%p554_p4)
}
  0x2a   :  { %43 = dma.hbm_to_vmem [thread:$0]  %s727_s2, 256, %s38_s9, [#allocation8], %s590_s0, %s590_s0, %s591_s5  }
  0x2b   :  { %580 = dma.done.wait [#allocation5], 32  }
  0x2c   :  { %581 = vsyncadd [#allocation5], 4294967264 }
  0x2d   :  { %582 = dma.done.wait [#allocation3], 256  }
  0x2e   :  { %583 = vsyncadd [#allocation3], 4294967040 }
  0x2f   :  { %584 = dma.done.wait [#allocation8], 256  }
  0x30   :  { %585 = vsyncadd [#allocation8], 4294967040 }
  0x31   :  { %53 = sfence }
  0x32   :  { %v488_v0 = vld [vmem:[#allocation7] sm:$0xff]   ;;  %v489_v1 = vld [vmem:[#allocation7 + $0x8] sm:$0xff]   ;;  %vm85_vm0 = vcmask 261120   ;;  %v490_v2 = vld [vmem:[#allocation6] sm:$0xff]   ;;  %v593_v12 = vmov 0.0   ;;  %vm594_vm1 = vmmov 0   ;;  %v165_v29 = vlaneseq }
  0x33   :  { %450 = vmatprep.subr.bf16.mxu0 %v488_v0  ;;  %454 = vmatprep.mubr.msk.bf16.mxu0 %vm85_vm0, %v490_v2  ;;  %v491_v3 = vld [vmem:[#allocation6 + $0x8] sm:$0xff]   ;;  %s654_s2 = sld [smem:[#allocation2]]  ;;  %s658_s20 = sld [smem:[#allocation2 + $0x1]]  ;;  %vm247_vm5 = vcmask 64512   ;;  %vm272_vm9 = vcmask 57344   ;;  %vm261_vm10 = vcmask 7168  }
  0x34   :  { %451 = vmatpush3.bf16.msra.mxu0 %v488_v0  ;;  %458 = vmatprep.subr.mxu1 %v593_v12  ;;  %s656_s19 = sld [smem:[#allocation2 + $0x80]]  ;;  %s660_s21 = sld [smem:[#allocation2 + $0x81]]  ;;  %v662_v30 = vshrl.u32 %v165_v29, 7  ;;  %v664_v31 = vand.u32 127, %v165_v29 }
  0x35   :  { %452 = vmatprep.subr.bf16.mxu0 %v489_v1  ;;  %460 = vmatprep.mubr.msk.f32.mxu1 %vm594_vm1, %v593_v12  ;;  %s595_s9 = smov [#allocation9]  }
  0x36   :  { %vm406_vm11 = vcmp.eq.s32.totalorder %v662_v30, 0  ;;  %vm407_vm12 = vcmp.eq.s32.totalorder %v664_v31, 0  ;;  %vm411_vm13 = vcmp.eq.s32.totalorder %v664_v31, 1  ;;  %s422_s10 = sshll.u32 %s595_s9, 4  ;;  %s423_s10 = int_to_ptr.vmem [resolvable:$true] %s422_s10 }
  0x37   :  { %vm408_vm14 = vmand %vm406_vm11, %vm407_vm12  ;;  %s558_s12 = scalar_lea.vmem %s423_s10, 128  ;;  %p563_p6 = scmp.lt.s32.totalorder %s423_s10, %s423_s10 }
  0x38   :  { %453 = vmatpush3.bf16.msra.mxu0 %v489_v1  ;;  %vm412_vm15 = vmand %vm406_vm11, %vm411_vm13  ;;  %p559_p5 = scmp.ne.s32.totalorder %s423_s10, %s558_s12  ;;  %p564_p7 = scmp.lt.s32.totalorder %s558_s12, %s558_s12 }
  0x39   :  { %v241_v32 = vstv %s654_s2  ;;  %v361_v36 = vstv %s658_s20  ;;  %s259_s22 = scvt.s32.f32 %s654_s2  ;;  %s378_s25 = scvt.s32.f32 %s658_s20 }
  0x3a   :  { %v243_v33 = vstv %s656_s19  ;;  %vm669_vm2 = vcmp.lt.s32.totalorder %v662_v30, %v241_v32  ;;  %v363_v37 = vstv %s660_s21  ;;  %vm685_vm6 = vcmp.lt.s32.totalorder %v662_v30, %v361_v36  ;;  %s260_s23 = scvt.s32.f32 %s656_s19  ;;  %s379_s26 = scvt.s32.f32 %s660_s21 }
  0x3b   :  { %455 = vmatmul.mubr.msk.bf16.vlgmr.msra.gmra.mrb[0].mxu0 %vm85_vm0, %v491_v3  ;;  %vm674_vm3 = vcmp.lt.s32.totalorder %v664_v31, %v243_v33  ;;  %vm690_vm7 = vcmp.lt.s32.totalorder %v664_v31, %v363_v37  ;;  %p565_p8 = por %p564_p7, %p563_p6 }
  0x3c   :  { %vm245_vm4 = vmand %vm669_vm2, %vm674_vm3  ;;  %s284_s24 = sadd.f32 %s260_s23, %s259_s22 }
  0x3d   :  { %vm365_vm8 = vmand %vm685_vm6, %vm690_vm7  ;;  %s401_s27 = sadd.f32 %s379_s26, %s378_s25  ;;  %p566_p9 = pnand %p565_p8, %p559_p5 }
 0x10e   :  { %v456_v4 = vpop.f32.mrb[0].mxu0 }
 0x10f   :  { %v126_v5 = vpop.f32.mrb[1].mxu0  ;;  %v143_v6 = vmul.f32 %v456_v4, %v456_v4 }
 0x110   :  { %v457_v7 = vpop.f32.mrb[2].mxu0  ;;  %v141_v10 = vmul.f32 %v126_v5, %v126_v5 }
 0x111   :  { %149 = vadd.xlane.f32.xlu0 %v143_v6  ;;  %v129_v8 = vpop.f32.mrb[3].mxu0  ;;  %v144_v9 = vmul.f32 %v457_v7, %v457_v7 }
 0x112   :  { %v142_v11 = vmul.f32 %v129_v8, %v129_v8 }
 0x113   :  { %151 = vadd.xlane.f32.xlu1 %v144_v9 }
 0x115   :  { %145 = vadd.xlane.f32.xlu0 %v141_v10 }
 0x117   :  { %147 = vadd.xlane.f32.xlu1 %v142_v11  ;;  %v285_v11 = vstv %s284_s24 }
 0x19e   :  { %v150_v13 = vpop.xlane.xlu0 %149 }
 0x19f   :  { %v155_v14 = vadd.f32 1e-16, %v150_v13 }
 0x1a0   :  { %v152_v15 = vpop.xlane.xlu1 %151 }
 0x1a1   :  { %492 = vrsqrt.f32 %v155_v14  ;;  %v156_v16 = vadd.f32 1e-16, %v152_v15 }
 0x1a2   :  { %v146_v17 = vpop.xlane.xlu0 %145 }
 0x1a3   :  { %v153_v18 = vadd.f32 1e-16, %v146_v17  ;;  %494 = vrsqrt.f32 %v156_v16  ;;  %v402_v17 = vstv %s401_s27 }
 0x1a4   :  { %v148_v19 = vpop.xlane.xlu1 %147 }
 0x1a5   :  { %496 = vrsqrt.f32 %v153_v18  ;;  %v154_v20 = vadd.f32 1e-16, %v148_v19 }
 0x1a7   :  { %498 = vrsqrt.f32 %v154_v20 }
 0x1a8   :  { %500 = vrcp.f32 %v285_v11 }
 0x1a9   :  { %502 = vrcp.f32 %v402_v17 }
 0x1ab   :  { %v493_v21 = vpop.eup %492 }
 0x1ac   :  { %v163_v22 = vmul.f32 %v493_v21, %v456_v4 }
 0x1ad   :  { %v495_v23 = vpop.eup %494 }
 0x1ae   :  { %459 = vmatpush3.xpose.msra.mxu1 %v163_v22  ;;  %v164_v27 = vmul.f32 %v495_v23, %v457_v7 }
 0x1af   :  { %v497_v24 = vpop.eup %496  ;;  %463 = vmatprep.subr.mxu1 %v593_v12 }
 0x1b0   :  { %v161_v25 = vmul.f32 %v497_v24, %v126_v5 }
 0x1b1   :  { %v499_v26 = vpop.eup %498 }
 0x1b2   :  { %461 = vmatmul.mubr.f32.vlgmr.msra.gmra.mrb[0].mxu1 %v161_v25  ;;  %v162_v28 = vmul.f32 %v499_v26, %v129_v8  ;;  %v501_v33 = vpop.eup %500 }
 0x1b3   :  { %464 = vmatpush3.xpose.msra.mxu1 %v164_v27  ;;  %465 = vmatprep.mubr.msk.f32.mxu1 %vm594_vm1, %v593_v12  ;;  %v503_v38 = vpop.eup %502 }
 0x1b6   :  { %466 = vmatmul.mubr.f32.vlgmr.msra.gmra.mrb[2].mxu1 %v162_v28 }
 0x285   :  { %v235_v40 = vpop.f32.mrb[0].mxu1 }
 0x286   :  { %v246_v41 = vsel %vm245_vm4, %v235_v40, -1e+30  ;;  %v462_v42 = vpop.f32.mrb[1].mxu1 }
 0x287   :  { %v248_v43 = vsel %vm247_vm5, %v246_v41, -inf }
 0x288   :  { %v252_v44 = vrot.slane %v248_v43, 4  ;;  %249 = vmax.xlane.f32.xlu0 %v248_v43 }
 0x289   :  { %v355_v45 = vpop.f32.mrb[2].mxu1 }
 0x28a   :  { %v253_v46 = vmax.f32 %v248_v43, %v252_v44  ;;  %v366_v47 = vsel %vm365_vm8, %v355_v45, -1e+30  ;;  %v467_v48 = vpop.f32.mrb[3].mxu1 }
 0x28b   :  { %v367_v49 = vsel %vm247_vm5, %v366_v47, -inf }
 0x28c   :  { %v254_v50 = vrot.slane %v253_v46, 2  ;;  %v371_v51 = vrot.slane %v367_v49, 4  ;;  %368 = vmax.xlane.f32.xlu1 %v367_v49 }
 0x28e   :  { %v372_v52 = vmax.f32 %v367_v49, %v371_v51  ;;  %v255_v53 = vmax.f32 %v253_v46, %v254_v50 }
 0x290   :  { %v373_v54 = vrot.slane %v372_v52, 2  ;;  %v256_v55 = vrot.slane %v255_v53, 1 }
 0x292   :  { %v257_v56 = vmax.f32 %v255_v53, %v256_v55  ;;  %v374_v57 = vmax.f32 %v372_v52, %v373_v54 }
 0x294   :  { %v258_v58 = vsel %vm674_vm3, %v257_v56, 0.0  ;;  %v375_v59 = vrot.slane %v374_v57, 1 }
 0x295   :  { %v273_v60 = vsel %vm272_vm9, %v258_v58, 0.0 }
 0x296   :  { %274 = vadd.xlane.f32.xlu1 %v273_v60  ;;  %v376_v61 = vmax.f32 %v374_v57, %v375_v59 }
 0x298   :  { %v377_v62 = vsel %vm690_vm7, %v376_v61, 0.0 }
 0x299   :  { %v390_v63 = vsel %vm272_vm9, %v377_v62, 0.0 }
 0x29a   :  { %391 = vadd.xlane.f32.xlu1 %v390_v63 }
 0x315   :  { %v250_v0 = vpop.xlane.xlu0 %249 }
 0x316   :  { %v251_v1 = vsel %vm669_vm2, %v250_v0, 0.0 }
 0x317   :  { %v262_v2 = vsel %vm261_vm10, %v251_v1, 0.0 }
 0x318   :  { %263 = vadd.xlane.f32.xlu0 %v262_v2 }
 0x319   :  { %v369_v3 = vpop.xlane.xlu1 %368 }
 0x31a   :  { %v370_v4 = vsel %vm685_vm6, %v369_v3, 0.0 }
 0x31b   :  { %v380_v5 = vsel %vm261_vm10, %v370_v4, 0.0 }
 0x31c   :  { %381 = vadd.xlane.f32.xlu0 %v380_v5 }
 0x323   :  { %v275_v6 = vpop.xlane.xlu1 %274 }
 0x324   :  { %v276_v7 = vrot.slane %v275_v6, 4 }
 0x326   :  { %v277_v9 = vadd.f32 %v276_v7, %v275_v6 }
 0x327   :  { %v392_v8 = vpop.xlane.xlu1 %391 }
 0x328   :  { %v393_v10 = vrot.slane %v392_v8, 4  ;;  %v278_v12 = vrot.slane %v277_v9, 2 }
 0x32a   :  { %v394_v13 = vadd.f32 %v393_v10, %v392_v8  ;;  %v279_v20 = vadd.f32 %v278_v12, %v277_v9 }
 0x32c   :  { %v395_v18 = vrot.slane %v394_v13, 2  ;;  %v280_v26 = vrot.slane %v279_v20, 1 }
 0x32e   :  { %v396_v25 = vadd.f32 %v395_v18, %v394_v13  ;;  %v281_v34 = vadd.f32 %v280_v26, %v279_v20 }
 0x330   :  { %v397_v35 = vrot.slane %v396_v25, 1 }
 0x332   :  { %v398_v39 = vadd.f32 %v397_v35, %v396_v25 }
 0x3a5   :  { %v264_v14 = vpop.xlane.xlu0 %263 }
 0x3a6   :  { %v265_v15 = vrot.slane %v264_v14, 4 }
 0x3a8   :  { %v266_v16 = vadd.f32 %v265_v15, %v264_v14 }
 0x3a9   :  { %v382_v19 = vpop.xlane.xlu0 %381 }
 0x3aa   :  { %v267_v21 = vrot.slane %v266_v16, 2  ;;  %v383_v22 = vrot.slane %v382_v19, 4 }
 0x3ac   :  { %v384_v23 = vadd.f32 %v383_v22, %v382_v19  ;;  %v268_v24 = vadd.f32 %v267_v21, %v266_v16 }
 0x3ae   :  { %v385_v27 = vrot.slane %v384_v23, 2  ;;  %v269_v28 = vrot.slane %v268_v24, 1 }
 0x3b0   :  { %v386_v29 = vadd.f32 %v385_v27, %v384_v23  ;;  %v270_v32 = vadd.f32 %v269_v28, %v268_v24 }
 0x3b2   :  { %468 = vpush %v270_v32  ;;  %v387_v36 = vrot.slane %v386_v29, 1 }
 0x3b3   :  { %470 = vpush %v281_v34 }
 0x3b4   :  { %472 = vpush %v501_v33  ;;  %v388_v37 = vadd.f32 %v387_v36, %v386_v29 }
 0x3b6   :  { %474 = vpush %v388_v37 }
 0x3b7   :  { %476 = vpush %v398_v39 }
 0x3b8   :  { %478 = vpush %v503_v38 }
 0x3e3   :  { %s469_s28 = spop %468 }
 0x3e4   :  { %s471_s29 = spop %470 }
 0x3e5   :  { %s283_s30 = sadd.f32 %s471_s29, %s469_s28  ;;  %s473_s4 = spop %472 }
 0x3e7   :  { %s288_s0 = smul.f32 %s473_s4, %s283_s30  ;;  %s475_s5 = spop %474 }
 0x3e8   :  { %s477_s6 = spop %476 }
 0x3e9   :  { %s400_s7 = sadd.f32 %s477_s6, %s475_s5  ;;  %s479_s8 = spop %478  ;;  %v409_v40 = vstv %s288_s0 }
 0x3ea   :  { %v410_v41 = vsel %vm408_vm14, %v409_v40, 0.0 }
 0x3eb   :  { %s405_s11 = smul.f32 %s479_s8, %s400_s7 }
 0x3ed   :  { %v413_v42 = vstv %s405_s11 }
 0x3ee   :  { %v414_v43 = vsel %vm412_vm15, %v413_v42, %v410_v41 }
 0x3ef   :  { %415 = vst [vmem:[#allocation9] sm:$0xff] %v414_v43 }
 0x3f0   :  { %569 = shalt.err (!%p566_p9)
}
 0x3f1   :  { %s570_s15 = scalar_lea.hbm %s728_s3, 128 }
 0x3f2   :  { %p571_p10 = scmp.ne.s32.totalorder %s728_s3, %s570_s15  ;;  %p574_p11 = scmp.lt.u32.totalorder %s570_s15, %s728_s3 }
 0x3f4   :  { %p576_p12 = pnand %p574_p11, %p571_p10 }
 0x3f6   :  { %579 = shalt.err (!%p576_p12)
}
 0x3f7   :  { %425 = dma.vmem_to_hbm [thread:$0]  %s423_s10, 128, %s728_s3, [#allocation4]  }
 0x3f8   :  { %586 = dma.done.wait [#allocation4], 128  }
 0x3f9   :  { %587 = vsyncadd [#allocation4], 4294967168 }
 0x3fa   :  { %429 = vsyncpa [#allocation3], 1 }
 0x3fb   :  { %430 = vsyncpa [#allocation8], 1 }
 0x3fc   :  { %431 = vsyncpa [#allocation4], 1 }
 0x3fd   :  { %432 = vsyncpa [#allocation5], 1 }

</bundles_post_ra>
